<compile_context>
chip_gen: v6e
topology: v6e:2x2x1
jax: 0.10.0
libtpu: 0.0.40
codegen_flags: <defaults>
</compile_context>

<pallas_src>
import functools

import jax
import jax.numpy as jnp
from jax.experimental import pallas as pl
from jax.experimental.pallas import tpu as pltpu


def _pad_plane_1px(x):
    """Zero-pad a 2-D (H, W) VMEM value by one element on every side.

    Pure in-VMEM op (concat with zero rows/cols); replaces the HBM-side
    jnp.pad of the previous version.
    """
    h, _ = x.shape
    zc = jnp.zeros((h, 1), x.dtype)
    x = jnp.concatenate([zc, x, zc], axis=1)        # (H,   W+2)  lane axis
    zr = jnp.zeros((1, x.shape[1]), x.dtype)
    return jnp.concatenate([zr, x, zr], axis=0)     # (H+2, W+2)  sublane axis


def conv1x1_sub_kernel(w_ref, b_ref, x2_ref, x3_ref, o_ref, *, pad_in_kernel):
    # w_ref : (Cout, Cin)        1x1 conv weight (24 floats, VMEM resident)
    # b_ref : (Cout, 1, 1)       conv bias
    # x2_ref: (1, Cin, H,  W )   raw input image        (pad_in_kernel=True)
    #         (1, Cin, Hp, Wp)   pre-padded input image (pad_in_kernel=False)
    # x3_ref: (1, Cout, Hp, Wp)  tensor to subtract
    # o_ref : (1, Cout, Hp, Wp)
    cin = x2_ref.shape[1]

    # Border pixels of the padded conv are exactly `bias - x3` (zero-padded
    # input contributes nothing there), so start the accumulator from that.
    acc = b_ref[...] - x3_ref[0]                    # (Cout, Hp, Wp)

    # Unrolled 3->8 channel mix on the VPU (a degenerate (T,3)x(3,8) MXU dot
    # would be pure latency + layout padding).  Each per-ci operand is loaded
    # straight from the ref so the whole (Cin,H,W) block is never held in
    # low-utilization vregs.
    for ci in range(cin):
        x_ci = x2_ref[0, ci]                        # (H, W) or (Hp, Wp)
        if pad_in_kernel:
            x_ci = _pad_plane_1px(x_ci)             # (Hp, Wp), zero border
        w_ci = w_ref[:, ci:ci + 1][..., None]       # (Cout, 1, 1)
        acc = acc + w_ci * x_ci[None]               # broadcast MAC on the VPU

    o_ref[0] = acc.astype(o_ref.dtype)              # single full-block store


def _forward(x2, x3, weight, bias, *, pad_in_kernel):
    """x2: (N, 3, H, W); x3: (N, 8, H+2, W+2) (conv-output shape, see note).

    weight: (C_out, C_in, 1, 1) PyTorch conv layout; bias: (C_out,).
    Returns conv(x2) - x3 with shape (N, 8, H+2, W+2).
    """
    N, Cin, H, W = x2.shape
    Cout = weight.shape[0]
    Hp, Wp = H + 2, W + 2            # padding=1, kernel=1, stride=1
    assert x3.shape == (N, Cout, Hp, Wp), x3.shape

    w2 = weight.reshape(Cout, Cin)
    b3 = bias.reshape(Cout, 1, 1)

    if pad_in_kernel:
        x2_in = x2                   # no HBM-side padding copy
        hin, win = H, W
    else:
        # Fallback only: materializes a padded x2 copy in HBM (extra traffic).
        x2_in = jnp.pad(x2, ((0, 0), (0, 0), (1, 1), (1, 1)))
        hin, win = Hp, Wp

    kernel = functools.partial(conv1x1_sub_kernel, pad_in_kernel=pad_in_kernel)

    # One whole image per grid step: the biggest possible tile for these
    # shapes (minimum per-step overhead on single-TC v5e/v6e); the batch axis
    # is "parallel" so N >= 2 shards across the two v7x TensorCores.
    return pl.pallas_call(
        kernel,
        out_shape=jax.ShapeDtypeStruct((N, Cout, Hp, Wp), x2.dtype),
        grid_spec=pltpu.PrefetchScalarGridSpec(
            num_scalar_prefetch=0,
            grid=(N,),
            in_specs=[
                pl.BlockSpec((Cout, Cin), lambda n: (0, 0)),              # weight
                pl.BlockSpec((Cout, 1, 1), lambda n: (0, 0, 0)),          # bias
                pl.BlockSpec((1, Cin, hin, win), lambda n: (n, 0, 0, 0)),  # x2
                pl.BlockSpec((1, Cout, Hp, Wp), lambda n: (n, 0, 0, 0)),   # x3
            ],
            out_specs=pl.BlockSpec((1, Cout, Hp, Wp), lambda n: (n, 0, 0, 0)),
        ),
        compiler_params=pltpu.CompilerParams(
            dimension_semantics=("parallel",)),
    )(w2, b3, x2_in, x3)


# Primary (pad-free) path and guarded fallback (pre-padded input).
model_forward = jax.jit(functools.partial(_forward, pad_in_kernel=True))
model_forward_prepad = jax.jit(functools.partial(_forward, pad_in_kernel=False))


def run_forward(x2, x3, weight, bias):
    try:
        return jax.block_until_ready(model_forward(x2, x3, weight, bias))
    except Exception:
        # Only reached if this Mosaic build cannot lower the unaligned
        # in-kernel concat; the fallback re-introduces the wrapper pad but is
        # bit-identical in results.
        return jax.block_until_ready(model_forward_prepad(x2, x3, weight, bias))


def reference_forward(x2, x3, weight, bias):
    """Pure-JAX reference (conv2d 1x1, padding=1, minus x3)."""
    y = jax.lax.conv_general_dilated(
        x2, weight, window_strides=(1, 1), padding=((1, 1), (1, 1)),
        dimension_numbers=("NCHW", "OIHW", "NCHW"),
        precision=jax.lax.Precision.HIGHEST)
    return y + bias.reshape(1, -1, 1, 1) - x3


if __name__ == "__main__":
    key = jax.random.PRNGKey(0)
    k_x2, k_x3, k_w, k_b = jax.random.split(key, 4)

    Cin, Cout = 3, 8
    weight = 0.1 * jax.random.normal(k_w, (Cout, Cin, 1, 1), dtype=jnp.float32)
    bias = 0.1 * jax.random.normal(k_b, (Cout,), dtype=jnp.float32)

    # Small test shape consistent with the module (batch=2, 3->8 ch, 16x16).
    N, H, W = 2, 16, 16
    Hp, Wp = H + 2, W + 2
    x2 = jax.random.normal(k_x2, (N, Cin, H, W), dtype=jnp.float32)
    x3 = jax.random.normal(k_x3, (N, Cout, Hp, Wp), dtype=jnp.float32)

    out = run_forward(x2, x3, weight, bias)
    ref = reference_forward(x2, x3, weight, bias)
    assert out.shape == (N, Cout, Hp, Wp), out.shape
    assert jnp.allclose(out, ref, atol=1e-4, rtol=1e-4), float(
        jnp.max(jnp.abs(out - ref)))

    # Original fuzz shape (1, 3, 64, 64); x3 uses the conv-output shape.
    x2b = jax.random.normal(k_x2, (1, Cin, 64, 64), dtype=jnp.float32)
    x3b = jax.random.normal(k_x3, (1, Cout, 66, 66), dtype=jnp.float32)
    outb = run_forward(x2b, x3b, weight, bias)
    refb = reference_forward(x2b, x3b, weight, bias)
    assert outb.shape == (1, Cout, 66, 66), outb.shape
    assert jnp.allclose(outb, refb, atol=1e-4, rtol=1e-4), float(
        jnp.max(jnp.abs(outb - refb)))

    print("KERNEL_OK")
</pallas_src>

<mosaic_0001>
module attributes {stable_mosaic.version = 11 : i64} {
  func.func @conv1x1_sub_kernel(%arg0: i32, %arg1: memref<8x3xf32, #tpu.memory_space<vmem>>, %arg2: memref<8x1x1xf32, #tpu.memory_space<vmem>>, %arg3: memref<1x3x16x16xf32, #tpu.memory_space<vmem>>, %arg4: memref<1x8x18x18xf32, #tpu.memory_space<vmem>>, %arg5: memref<1x8x18x18xf32, #tpu.memory_space<vmem>>) attributes {dimension_semantics = [#tpu.dimension_semantics<parallel>], iteration_bounds = array<i64: 2>, scalar_prefetch = 0 : i64, scratch_operands = 0 : i64, tpu.core_type = #tpu.core_type<tc>, window_params = [{pipeline_mode = #tpu.pipeline_mode<synchronous>, transform_indices = @transform_0, window_bounds = array<i64: 8, 3>}, {pipeline_mode = #tpu.pipeline_mode<synchronous>, transform_indices = @transform_1, window_bounds = array<i64: 8, 1, 1>}, {transform_indices = @transform_2, window_bounds = array<i64: 1, 3, 16, 16>}, {transform_indices = @transform_3, window_bounds = array<i64: 1, 8, 18, 18>}, {transform_indices = @transform_4, window_bounds = array<i64: 1, 8, 18, 18>}]} {
    %c0 = arith.constant 0 : index
    %c0_0 = arith.constant 0 : index
    %c0_1 = arith.constant 0 : index
    %0 = vector.load %arg2[%c0, %c0_0, %c0_1] : memref<8x1x1xf32, #tpu.memory_space<vmem>>, vector<8x1x1xf32>
    %c0_2 = arith.constant 0 : index
    %c0_3 = arith.constant 0 : index
    %c0_4 = arith.constant 0 : index
    %c0_5 = arith.constant 0 : index
    %1 = vector.load %arg4[%c0_2, %c0_3, %c0_4, %c0_5] : memref<1x8x18x18xf32, #tpu.memory_space<vmem>>, vector<1x8x18x18xf32>
    %2 = vector.shape_cast %1 : vector<1x8x18x18xf32> to vector<8x18x18xf32>
    %3 = vector.broadcast %0 : vector<8x1x1xf32> to vector<8x18x18xf32>
    %4 = arith.subf %3, %2 : vector<8x18x18xf32>
    %c0_6 = arith.constant 0 : index
    %c0_7 = arith.constant 0 : index
    %c0_8 = arith.constant 0 : index
    %c0_9 = arith.constant 0 : index
    %5 = vector.load %arg3[%c0_6, %c0_7, %c0_8, %c0_9] : memref<1x3x16x16xf32, #tpu.memory_space<vmem>>, vector<1x1x16x16xf32>
    %6 = vector.shape_cast %5 : vector<1x1x16x16xf32> to vector<16x16xf32>
    %cst = arith.constant 0.000000e+00 : f32
    %7 = vector.broadcast %cst : f32 to vector<16x1xf32>
    %8 = tpu.concatenate %7, %6, %7 in 1 : vector<16x1xf32>, vector<16x16xf32>, vector<16x1xf32> -> vector<16x18xf32>
    %cst_10 = arith.constant 0.000000e+00 : f32
    %9 = vector.broadcast %cst_10 : f32 to vector<1x18xf32>
    %10 = tpu.concatenate %9, %8, %9 in 0 : vector<1x18xf32>, vector<16x18xf32>, vector<1x18xf32> -> vector<18x18xf32>
    %c0_11 = arith.constant 0 : index
    %c0_12 = arith.constant 0 : index
    %11 = vector.load %arg1[%c0_11, %c0_12] : memref<8x3xf32, #tpu.memory_space<vmem>>, vector<8x1xf32>
    %12 = vector.shape_cast %11 : vector<8x1xf32> to vector<8x1x1xf32>
    %13 = vector.shape_cast %10 : vector<18x18xf32> to vector<1x18x18xf32>
    %14 = vector.broadcast %12 : vector<8x1x1xf32> to vector<8x18x18xf32>
    %15 = vector.broadcast %13 : vector<1x18x18xf32> to vector<8x18x18xf32>
    %16 = arith.mulf %14, %15 : vector<8x18x18xf32>
    %17 = arith.addf %4, %16 : vector<8x18x18xf32>
    %c0_13 = arith.constant 0 : index
    %c1 = arith.constant 1 : index
    %c0_14 = arith.constant 0 : index
    %c0_15 = arith.constant 0 : index
    %18 = vector.load %arg3[%c0_13, %c1, %c0_14, %c0_15] : memref<1x3x16x16xf32, #tpu.memory_space<vmem>>, vector<1x1x16x16xf32>
    %19 = vector.shape_cast %18 : vector<1x1x16x16xf32> to vector<16x16xf32>
    %cst_16 = arith.constant 0.000000e+00 : f32
    %20 = vector.broadcast %cst_16 : f32 to vector<16x1xf32>
    %21 = tpu.concatenate %20, %19, %20 in 1 : vector<16x1xf32>, vector<16x16xf32>, vector<16x1xf32> -> vector<16x18xf32>
    %cst_17 = arith.constant 0.000000e+00 : f32
    %22 = vector.broadcast %cst_17 : f32 to vector<1x18xf32>
    %23 = tpu.concatenate %22, %21, %22 in 0 : vector<1x18xf32>, vector<16x18xf32>, vector<1x18xf32> -> vector<18x18xf32>
    %c0_18 = arith.constant 0 : index
    %c1_19 = arith.constant 1 : index
    %24 = vector.load %arg1[%c0_18, %c1_19] : memref<8x3xf32, #tpu.memory_space<vmem>>, vector<8x1xf32>
    %25 = vector.shape_cast %24 : vector<8x1xf32> to vector<8x1x1xf32>
    %26 = vector.shape_cast %23 : vector<18x18xf32> to vector<1x18x18xf32>
    %27 = vector.broadcast %25 : vector<8x1x1xf32> to vector<8x18x18xf32>
    %28 = vector.broadcast %26 : vector<1x18x18xf32> to vector<8x18x18xf32>
    %29 = arith.mulf %27, %28 : vector<8x18x18xf32>
    %30 = arith.addf %17, %29 : vector<8x18x18xf32>
    %c0_20 = arith.constant 0 : index
    %c2 = arith.constant 2 : index
    %c0_21 = arith.constant 0 : index
    %c0_22 = arith.constant 0 : index
    %31 = vector.load %arg3[%c0_20, %c2, %c0_21, %c0_22] : memref<1x3x16x16xf32, #tpu.memory_space<vmem>>, vector<1x1x16x16xf32>
    %32 = vector.shape_cast %31 : vector<1x1x16x16xf32> to vector<16x16xf32>
    %cst_23 = arith.constant 0.000000e+00 : f32
    %33 = vector.broadcast %cst_23 : f32 to vector<16x1xf32>
    %34 = tpu.concatenate %33, %32, %33 in 1 : vector<16x1xf32>, vector<16x16xf32>, vector<16x1xf32> -> vector<16x18xf32>
    %cst_24 = arith.constant 0.000000e+00 : f32
    %35 = vector.broadcast %cst_24 : f32 to vector<1x18xf32>
    %36 = tpu.concatenate %35, %34, %35 in 0 : vector<1x18xf32>, vector<16x18xf32>, vector<1x18xf32> -> vector<18x18xf32>
    %c0_25 = arith.constant 0 : index
    %c2_26 = arith.constant 2 : index
    %37 = vector.load %arg1[%c0_25, %c2_26] : memref<8x3xf32, #tpu.memory_space<vmem>>, vector<8x1xf32>
    %38 = vector.shape_cast %37 : vector<8x1xf32> to vector<8x1x1xf32>
    %39 = vector.shape_cast %36 : vector<18x18xf32> to vector<1x18x18xf32>
    %40 = vector.broadcast %38 : vector<8x1x1xf32> to vector<8x18x18xf32>
    %41 = vector.broadcast %39 : vector<1x18x18xf32> to vector<8x18x18xf32>
    %42 = arith.mulf %40, %41 : vector<8x18x18xf32>
    %43 = arith.addf %30, %42 : vector<8x18x18xf32>
    %c0_27 = arith.constant 0 : index
    %c0_28 = arith.constant 0 : index
    %c0_29 = arith.constant 0 : index
    %c0_30 = arith.constant 0 : index
    %44 = vector.load %arg5[%c0_27, %c0_28, %c0_29, %c0_30] : memref<1x8x18x18xf32, #tpu.memory_space<vmem>>, vector<1x8x18x18xf32>
    %45 = vector.shape_cast %44 : vector<1x8x18x18xf32> to vector<8x18x18xf32>
    %46 = vector.shape_cast %43 : vector<8x18x18xf32> to vector<1x8x18x18xf32>
    tpu.vector_store %arg5[%c0_27, %c0_28, %c0_29, %c0_30], %46 {strides = array<i32>} : memref<1x8x18x18xf32, #tpu.memory_space<vmem>>, vector<1x8x18x18xf32>,
    return
  }
  func.func @transform_0(%arg0: i32) -> (i32, i32) {
    %c0_i32 = arith.constant 0 : i32
    %c0_i32_0 = arith.constant 0 : i32
    %c0_i32_1 = arith.constant 0 : i32
    return %c0_i32, %c0_i32_0 : i32, i32
  }
  func.func @transform_1(%arg0: i32) -> (i32, i32, i32) {
    %c0_i32 = arith.constant 0 : i32
    %c0_i32_0 = arith.constant 0 : i32
    %c0_i32_1 = arith.constant 0 : i32
    %c0_i32_2 = arith.constant 0 : i32
    return %c0_i32, %c0_i32_0, %c0_i32_1 : i32, i32, i32
  }
  func.func @transform_2(%arg0: i32) -> (i32, i32, i32, i32) {
    %c0_i32 = arith.constant 0 : i32
    %c0_i32_0 = arith.constant 0 : i32
    %c0_i32_1 = arith.constant 0 : i32
    %c0_i32_2 = arith.constant 0 : i32
    return %arg0, %c0_i32, %c0_i32_0, %c0_i32_1 : i32, i32, i32, i32
  }
  func.func @transform_3(%arg0: i32) -> (i32, i32, i32, i32) {
    %c0_i32 = arith.constant 0 : i32
    %c0_i32_0 = arith.constant 0 : i32
    %c0_i32_1 = arith.constant 0 : i32
    %c0_i32_2 = arith.constant 0 : i32
    return %arg0, %c0_i32, %c0_i32_0, %c0_i32_1 : i32, i32, i32, i32
  }
  func.func @transform_4(%arg0: i32) -> (i32, i32, i32, i32) {
    %c0_i32 = arith.constant 0 : i32
    %c0_i32_0 = arith.constant 0 : i32
    %c0_i32_1 = arith.constant 0 : i32
    %c0_i32_2 = arith.constant 0 : i32
    return %arg0, %c0_i32, %c0_i32_0, %c0_i32_1 : i32, i32, i32, i32
  }
}

module attributes {stable_mosaic.version = 11 : i64} {
  func.func @conv1x1_sub_kernel(%arg0: i32, %arg1: memref<8x3xf32, #tpu.memory_space<vmem>>, %arg2: memref<8x1x1xf32, #tpu.memory_space<vmem>>, %arg3: memref<1x3x18x18xf32, #tpu.memory_space<vmem>>, %arg4: memref<1x8x18x18xf32, #tpu.memory_space<vmem>>, %arg5: memref<1x8x18x18xf32, #tpu.memory_space<vmem>>) attributes {dimension_semantics = [#tpu.dimension_semantics<parallel>], iteration_bounds = array<i64: 2>, scalar_prefetch = 0 : i64, scratch_operands = 0 : i64, tpu.core_type = #tpu.core_type<tc>, window_params = [{pipeline_mode = #tpu.pipeline_mode<synchronous>, transform_indices = @transform_0, window_bounds = array<i64: 8, 3>}, {pipeline_mode = #tpu.pipeline_mode<synchronous>, transform_indices = @transform_1, window_bounds = array<i64: 8, 1, 1>}, {transform_indices = @transform_2, window_bounds = array<i64: 1, 3, 18, 18>}, {transform_indices = @transform_3, window_bounds = array<i64: 1, 8, 18, 18>}, {transform_indices = @transform_4, window_bounds = array<i64: 1, 8, 18, 18>}]} {
    %c0 = arith.constant 0 : index
    %c0_0 = arith.constant 0 : index
    %c0_1 = arith.constant 0 : index
    %0 = vector.load %arg2[%c0, %c0_0, %c0_1] : memref<8x1x1xf32, #tpu.memory_space<vmem>>, vector<8x1x1xf32>
    %c0_2 = arith.constant 0 : index
    %c0_3 = arith.constant 0 : index
    %c0_4 = arith.constant 0 : index
    %c0_5 = arith.constant 0 : index
    %1 = vector.load %arg4[%c0_2, %c0_3, %c0_4, %c0_5] : memref<1x8x18x18xf32, #tpu.memory_space<vmem>>, vector<1x8x18x18xf32>
    %2 = vector.shape_cast %1 : vector<1x8x18x18xf32> to vector<8x18x18xf32>
    %3 = vector.broadcast %0 : vector<8x1x1xf32> to vector<8x18x18xf32>
    %4 = arith.subf %3, %2 : vector<8x18x18xf32>
    %c0_6 = arith.constant 0 : index
    %c0_7 = arith.constant 0 : index
    %c0_8 = arith.constant 0 : index
    %c0_9 = arith.constant 0 : index
    %5 = vector.load %arg3[%c0_6, %c0_7, %c0_8, %c0_9] : memref<1x3x18x18xf32, #tpu.memory_space<vmem>>, vector<1x1x18x18xf32>
    %6 = vector.shape_cast %5 : vector<1x1x18x18xf32> to vector<18x18xf32>
    %c0_10 = arith.constant 0 : index
    %c0_11 = arith.constant 0 : index
    %7 = vector.load %arg1[%c0_10, %c0_11] : memref<8x3xf32, #tpu.memory_space<vmem>>, vector<8x1xf32>
    %8 = vector.shape_cast %7 : vector<8x1xf32> to vector<8x1x1xf32>
    %9 = vector.shape_cast %6 : vector<18x18xf32> to vector<1x18x18xf32>
    %10 = vector.broadcast %8 : vector<8x1x1xf32> to vector<8x18x18xf32>
    %11 = vector.broadcast %9 : vector<1x18x18xf32> to vector<8x18x18xf32>
    %12 = arith.mulf %10, %11 : vector<8x18x18xf32>
    %13 = arith.addf %4, %12 : vector<8x18x18xf32>
    %c0_12 = arith.constant 0 : index
    %c1 = arith.constant 1 : index
    %c0_13 = arith.constant 0 : index
    %c0_14 = arith.constant 0 : index
    %14 = vector.load %arg3[%c0_12, %c1, %c0_13, %c0_14] : memref<1x3x18x18xf32, #tpu.memory_space<vmem>>, vector<1x1x18x18xf32>
    %15 = vector.shape_cast %14 : vector<1x1x18x18xf32> to vector<18x18xf32>
    %c0_15 = arith.constant 0 : index
    %c1_16 = arith.constant 1 : index
    %16 = vector.load %arg1[%c0_15, %c1_16] : memref<8x3xf32, #tpu.memory_space<vmem>>, vector<8x1xf32>
    %17 = vector.shape_cast %16 : vector<8x1xf32> to vector<8x1x1xf32>
    %18 = vector.shape_cast %15 : vector<18x18xf32> to vector<1x18x18xf32>
    %19 = vector.broadcast %17 : vector<8x1x1xf32> to vector<8x18x18xf32>
    %20 = vector.broadcast %18 : vector<1x18x18xf32> to vector<8x18x18xf32>
    %21 = arith.mulf %19, %20 : vector<8x18x18xf32>
    %22 = arith.addf %13, %21 : vector<8x18x18xf32>
    %c0_17 = arith.constant 0 : index
    %c2 = arith.constant 2 : index
    %c0_18 = arith.constant 0 : index
    %c0_19 = arith.constant 0 : index
    %23 = vector.load %arg3[%c0_17, %c2, %c0_18, %c0_19] : memref<1x3x18x18xf32, #tpu.memory_space<vmem>>, vector<1x1x18x18xf32>
    %24 = vector.shape_cast %23 : vector<1x1x18x18xf32> to vector<18x18xf32>
    %c0_20 = arith.constant 0 : index
    %c2_21 = arith.constant 2 : index
    %25 = vector.load %arg1[%c0_20, %c2_21] : memref<8x3xf32, #tpu.memory_space<vmem>>, vector<8x1xf32>
    %26 = vector.shape_cast %25 : vector<8x1xf32> to vector<8x1x1xf32>
    %27 = vector.shape_cast %24 : vector<18x18xf32> to vector<1x18x18xf32>
    %28 = vector.broadcast %26 : vector<8x1x1xf32> to vector<8x18x18xf32>
    %29 = vector.broadcast %27 : vector<1x18x18xf32> to vector<8x18x18xf32>
    %30 = arith.mulf %28, %29 : vector<8x18x18xf32>
    %31 = arith.addf %22, %30 : vector<8x18x18xf32>
    %c0_22 = arith.constant 0 : index
    %c0_23 = arith.constant 0 : index
    %c0_24 = arith.constant 0 : index
    %c0_25 = arith.constant 0 : index
    %32 = vector.load %arg5[%c0_22, %c0_23, %c0_24, %c0_25] : memref<1x8x18x18xf32, #tpu.memory_space<vmem>>, vector<1x8x18x18xf32>
    %33 = vector.shape_cast %32 : vector<1x8x18x18xf32> to vector<8x18x18xf32>
    %34 = vector.shape_cast %31 : vector<8x18x18xf32> to vector<1x8x18x18xf32>
    tpu.vector_store %arg5[%c0_22, %c0_23, %c0_24, %c0_25], %34 {strides = array<i32>} : memref<1x8x18x18xf32, #tpu.memory_space<vmem>>, vector<1x8x18x18xf32>,
    return
  }
  func.func @transform_0(%arg0: i32) -> (i32, i32) {
    %c0_i32 = arith.constant 0 : i32
    %c0_i32_0 = arith.constant 0 : i32
    %c0_i32_1 = arith.constant 0 : i32
    return %c0_i32, %c0_i32_0 : i32, i32
  }
  func.func @transform_1(%arg0: i32) -> (i32, i32, i32) {
    %c0_i32 = arith.constant 0 : i32
    %c0_i32_0 = arith.constant 0 : i32
    %c0_i32_1 = arith.constant 0 : i32
    %c0_i32_2 = arith.constant 0 : i32
    return %c0_i32, %c0_i32_0, %c0_i32_1 : i32, i32, i32
  }
  func.func @transform_2(%arg0: i32) -> (i32, i32, i32, i32) {
    %c0_i32 = arith.constant 0 : i32
    %c0_i32_0 = arith.constant 0 : i32
    %c0_i32_1 = arith.constant 0 : i32
    %c0_i32_2 = arith.constant 0 : i32
    return %arg0, %c0_i32, %c0_i32_0, %c0_i32_1 : i32, i32, i32, i32
  }
  func.func @transform_3(%arg0: i32) -> (i32, i32, i32, i32) {
    %c0_i32 = arith.constant 0 : i32
    %c0_i32_0 = arith.constant 0 : i32
    %c0_i32_1 = arith.constant 0 : i32
    %c0_i32_2 = arith.constant 0 : i32
    return %arg0, %c0_i32, %c0_i32_0, %c0_i32_1 : i32, i32, i32, i32
  }
  func.func @transform_4(%arg0: i32) -> (i32, i32, i32, i32) {
    %c0_i32 = arith.constant 0 : i32
    %c0_i32_0 = arith.constant 0 : i32
    %c0_i32_1 = arith.constant 0 : i32
    %c0_i32_2 = arith.constant 0 : i32
    return %arg0, %c0_i32, %c0_i32_0, %c0_i32_1 : i32, i32, i32, i32
  }
}

</mosaic_0001>

<bundles_post_ra>
// kernel: _forward.1
= control target key start
LH: loop header
LB: loop body
LE: loop exit
PB: predicated region body
PF: predicated region fallthrough
CT: control target
= control target key end

     0   :  { %s1087_s15 = smov 0   ;;  %s1575_s0 = inlined_call_operand.vmem [shape: f32[8,3], index: 0, kind: input, shape index: {}]   ;;  %s1576_s1 = inlined_call_operand.vmem [shape: f32[8,1,1], index: 1, kind: input, shape index: {}]   ;;  %s1577_s2 = inlined_call_operand.vmem [shape: f32[2,3,16,16], index: 2, kind: input, shape index: {}]   ;;  %s1578_s3 = inlined_call_operand.vmem [shape: f32[2,8,18,18], index: 3, kind: input, shape index: {}]   ;;  %s1579_s4 = inlined_call_operand.vmem [shape: f32[2,8,18,18], index: 4, kind: output, shape index: {}]  }
   0x1 LB: > { %s1005_s16 = sadd.s32 4294967295, %s1055_s15   ;;  %p1009_p0 = scmp.ge.s32.totalorder %s1055_s15, 1  ;;  %s1055_s15 = sphi %s1087_s15, %s14_s15  }
   0x2   : > { %p172_p1 = scmp.lt.s32.totalorder %s1055_s15, 3 }
   0x4   : > { %p173_p2 = pnand %p1009_p0, %p172_p1 }
   0x5   : > { %p203_p3 = scmp.lt.s32.totalorder (!%p173_p2), %s1005_s16, 1  ;;  %s1059_s13 = smov (!%p173_p2), 1  }
   0x6   : > { %176 = sbr.rel (%p173_p2) target bundleno = 222 (0xde), region = 36 }
   0xb   : > { %v1015_v0 = vld [vmem:[%s1576_s1 + $0x2] ss:$0 sm:$0xff]  ;;  %v1013_v1 = vld [vmem:[%s1576_s1] ss:$0 sm:$0xff]  ;;  %v379_v2 = vlaneseq  ;;  %v1057_v3 = vmov 0   ;;  %s1587_s16 = smov (!%p203_p3, %s1005_s16), 1 }
   0xc   : > { %1043 = vset.pattern.permute.xlu1 %v1057_v3  ;;  %1042 = vset.pattern.permute.xlu0 %v1057_v3  ;;  %v1016_v4 = vld [vmem:[%s1576_s1 + $0x3] ss:$0 sm:$0xff]  ;;  %v1014_v5 = vld [vmem:[%s1576_s1 + $0x1] ss:$0 sm:$0xff]  ;;  %v1058_v6 = vmov 1966171168  }
   0xd   : > { %299 = vperm.xlu1 %1043, %v1015_v0   ;;  %291 = vperm.xlu0 %1042, %v1013_v1   ;;  %v377_v7 = vunpack.c.l.s4 %v1058_v6  ;;  %v380_v8 = vshrl.u32 %v379_v2, 7  ;;  %v1018_v10 = vld [vmem:[%s1576_s1 + $0x5] ss:$0 sm:$0xff]  ;;  %v1017_v11 = vld [vmem:[%s1576_s1 + $0x4] ss:$0 sm:$0xff]  ;;  %s1027_s5 = smul.u32 48, %s1587_s16 }
   0xe   : > { %v373_v12 = vld [vmem:[%s1575_s0] sm:$0xff]  ;;  %v1060_v42 = vmov 1   ;;  %v1061_v45 = vmov 2   ;;  %vm356_vm0 = vcmask 7168   ;;  %s1028_s14 = smul.u32 192, %s1587_s16  ;;  %vm359_vm1 = vcmask 138240  }
   0xf   : > { %v378_v9 = vunpack.c.0.s8 %v377_v7  ;;  %v375_v14 = vcombine.high %v373_v12, %v373_v12  ;;  %v1020_v16 = vld [vmem:[%s1576_s1 + $0x7] ss:$0 sm:$0xff]  ;;  %v1019_v17 = vld [vmem:[%s1576_s1 + $0x6] ss:$0 sm:$0xff]  ;;  %s1128_s12 = scalar_lea.vmem %s1577_s2, %s1027_s5  ;;  %v426_v19 = vsub.s32 0, %v380_v8  ;;  %vm364_vm2 = vcmask 1040384  }
  0x10   : > { %v347_v23 = vld [vmem:[%s1128_s12 + $0x8] sm:$0xff]  ;;  %v346_v24 = vld [vmem:[%s1128_s12] sm:$0xff]  ;;  %v1022_v40 = vld [vmem:[%s1128_s12 + $0x18] sm:$0xff]  ;;  %s1170_s19 = scalar_lea.vmem %s1578_s3, %s1028_s14  ;;  %vm912_vm3 = vcmask 146432   ;;  %vm915_vm4 = vcmask 140288   ;;  %s1471_s22 = scalar_lea.vmem %s1579_s4, %s1028_s14 }
  0x11   : > { %303 = vperm.xlu1 %1043, %v1016_v4   ;;  %295 = vperm.xlu0 %1042, %v1014_v5   ;;  %v381_v13 = vsub.s32 %v378_v9, %v380_v8  ;;  %v1021_v41 = vld [vmem:[%s1128_s12 + $0x10] sm:$0xff]  ;;  %v1023_v43 = vld [vmem:[%s1128_s12 + $0x20] sm:$0xff]  ;;  %v1024_v44 = vld [vmem:[%s1128_s12 + $0x28] sm:$0xff] }
  0x12   : > { %v1179_v0 = vld [vmem:[%s1170_s19 + $0x30] sm:$0xff]  ;;  %v1182_v1 = vld [vmem:[%s1170_s19 + $0x38] sm:$0xff]  ;;  %v1185_v2 = vld [vmem:[%s1170_s19 + $0x40] sm:$0x3] }
  0x13   : > { %v382_v15 = vrot.slane %v373_v12, %v381_v13  ;;  %v389_v21 = vrot.slane %v375_v14, %v381_v13  ;;  %v1188_v3 = vld [vmem:[%s1170_s19] sm:$0xff]  ;;  %v1191_v4 = vld [vmem:[%s1170_s19 + $0x8] sm:$0xff]  ;;  %v1194_v5 = vld [vmem:[%s1170_s19 + $0x10] sm:$0x3] }
  0x14   : > { %v1201_v9 = vld [vmem:[%s1170_s19 + $0x48] sm:$0xff] }
  0x15   : > { %311 = vperm.xlu1 %1043, %v1018_v10   ;;  %307 = vperm.xlu0 %1042, %v1017_v11   ;;  %v390_v18 = vcombine.high %v382_v15, %v382_v15  ;;  %v398_v20 = vrot.slane %v382_v15, %v381_v13  ;;  %v391_v26 = vcombine.high %v389_v21, %v389_v21  ;;  %v1204_v10 = vld [vmem:[%s1170_s19 + $0x50] sm:$0xff]  ;;  %v1207_v11 = vld [vmem:[%s1170_s19 + $0x58] sm:$0x3] }
  0x16   : > { %v405_v30 = vrot.slane %v389_v21, %v381_v13  ;;  %v229_v15 = vld [vmem:[%s1170_s19 + $0x18] sm:$0xff] }
  0x17   : > { %v412_v22 = vrot.slane %v390_v18, %v381_v13  ;;  %v427_v25 = vrot.slane %v398_v20, %v426_v19  ;;  %v420_v29 = vcombine.high %v398_v20, %v398_v20  ;;  %v419_v33 = vrot.slane %v391_v26, %v381_v13 }
  0x18   : > { %v443_v34 = vrot.slane %v405_v30, %v426_v19  ;;  %v421_v37 = vcombine.high %v405_v30, %v405_v30  ;;  %v1246_v30 = vld [vmem:[%s1170_s19 + $0x70] sm:$0x3] }
  0x19   : > { %319 = vperm.xlu1 %1043, %v1020_v16   ;;  %315 = vperm.xlu0 %1042, %v1019_v17   ;;  %v431_v27 = vrot.slane %v412_v22, %v426_v19  ;;  %v422_v28 = vcombine.high %v412_v22, %v412_v22  ;;  %v435_v32 = vrot.slane %v420_v29, %v426_v19  ;;  %v230_v16 = vld [vmem:[%s1170_s19 + $0x20] sm:$0xff]  ;;  %v231_v17 = vld [vmem:[%s1170_s19 + $0x28] sm:$0x3]  ;;  %v1225_v22 = vld [vmem:[%s1170_s19 + $0x78] sm:$0xff] }
  0x1a   : > { %v447_v35 = vrot.slane %v419_v33, %v426_v19  ;;  %v423_v36 = vcombine.high %v419_v33, %v419_v33  ;;  %v451_v39 = vrot.slane %v421_v37, %v426_v19  ;;  %v1243_v29 = vld [vmem:[%s1170_s19 + $0x68] sm:$0xff] }
  0x1b   : > { %v439_v31 = vrot.slane %v422_v28, %v426_v19  ;;  %v1240_v28 = vld [vmem:[%s1170_s19 + $0x60] sm:$0xff]  ;;  %v1259_v37 = vld [vmem:[%s1170_s19 + $0xa8] sm:$0xff] }
  0x1c   : > { %v455_v38 = vrot.slane %v423_v36, %v426_v19 }
  0x1d   : > { %352 = vrot.lane.b32.xlu1 %v347_v23, %s1059_s13  ;;  %350 = vrot.lane.b32.xlu0 %v346_v24, %s1059_s13  ;;  %v1228_v23 = vld [vmem:[%s1170_s19 + $0x80] sm:$0xff]  ;;  %v1231_v24 = vld [vmem:[%s1170_s19 + $0x88] sm:$0x3] }
  0x21   : > { %461 = vperm.xlu1 %1043, %v431_v27   ;;  %457 = vperm.xlu0 %1042, %v427_v25  }
  0x25   : > { %469 = vperm.xlu1 %1043, %v439_v31   ;;  %465 = vperm.xlu0 %1042, %v435_v32  }
  0x29   : > { %477 = vperm.xlu1 %1043, %v447_v35   ;;  %473 = vperm.xlu0 %1042, %v443_v34  }
  0x2d   : > { %485 = vperm.xlu1 %1043, %v455_v38   ;;  %481 = vperm.xlu0 %1042, %v451_v39  }
  0x31   : > { %543 = vrot.lane.b32.xlu1 %v1022_v40, %s1059_s13  ;;  %541 = vrot.lane.b32.xlu0 %v1021_v41, %s1059_s13 }
  0x32   : > { %1045 = vset.pattern.permute.xlu1 %v1060_v42  ;;  %1044 = vset.pattern.permute.xlu0 %v1060_v42 }
  0x35   : > { %649 = vperm.xlu1 %1045, %v431_v27   ;;  %645 = vperm.xlu0 %1044, %v427_v25  }
  0x39   : > { %653 = vperm.xlu1 %1045, %v435_v32   ;;  %657 = vperm.xlu0 %1044, %v439_v31  }
  0x3d   : > { %661 = vperm.xlu1 %1045, %v443_v34   ;;  %665 = vperm.xlu0 %1044, %v447_v35  }
  0x41   : > { %669 = vperm.xlu1 %1045, %v451_v39   ;;  %673 = vperm.xlu0 %1044, %v455_v38  }
  0x45   : > { %729 = vrot.lane.b32.xlu1 %v1023_v43, %s1059_s13  ;;  %731 = vrot.lane.b32.xlu0 %v1024_v44, %s1059_s13 }
  0x46   : > { %1046 = vset.pattern.permute.xlu1 %v1061_v45  ;;  %1047 = vset.pattern.permute.xlu0 %v1061_v45 }
  0x49   : > { %833 = vperm.xlu1 %1046, %v427_v25   ;;  %837 = vperm.xlu0 %1047, %v431_v27  }
  0x4d   : > { %841 = vperm.xlu1 %1046, %v435_v32   ;;  %849 = vperm.xlu0 %1047, %v443_v34  }
  0x51   : > { %845 = vperm.xlu1 %1046, %v439_v31   ;;  %857 = vperm.xlu0 %1047, %v451_v39   ;;  %v1265_v39 = vld [vmem:[%s1170_s19 + $0xb8] sm:$0x3] }
  0x55   : > { %853 = vperm.xlu1 %1046, %v447_v35  }
  0x59   : > { %861 = vperm.xlu1 %1046, %v455_v38   ;;  %v1262_v38 = vld [vmem:[%s1170_s19 + $0xb0] sm:$0xff] }
  0x88   : > { %v1142_v46 = vpop.permute.xlu1 %299  ;;  %v1144_v47 = vpop.permute.xlu0 %291 }
  0x89   : > { %v328_v13 = vsub.f32 %v1142_v46, %v1179_v0  ;;  %v329_v14 = vsub.f32 %v1142_v46, %v1182_v1  ;;  %v322_v19 = vsub.f32 %v1144_v47, %v1188_v3  ;;  %v323_v20 = vsub.f32 %v1144_v47, %v1191_v4  ;;  %v1300_v3 = vld [vmem:[%s1170_s19 + $0xa0] sm:$0x3] }
  0x8a   : > { %v324_v21 = vsub.f32 %v1144_v47, %v1194_v5 }
  0x8c   : > { %v1146_v48 = vpop.permute.xlu1 %303  ;;  %v1148_v49 = vpop.permute.xlu0 %295 }
  0x8d   : > { %v331_v25 = vsub.f32 %v1146_v48, %v1201_v9  ;;  %v332_v26 = vsub.f32 %v1146_v48, %v1204_v10  ;;  %v333_v27 = vsub.f32 %v1146_v48, %v1207_v11  ;;  %v325_v34 = vsub.f32 %v1148_v49, %v229_v15 }
  0x8e   : > { %v326_v35 = vsub.f32 %v1148_v49, %v230_v16  ;;  %v327_v36 = vsub.f32 %v1148_v49, %v231_v17  ;;  %v1580_v11 = vsub.f32 %v1142_v46, %v1185_v2 }
  0x90   : > { %v1150_v50 = vpop.permute.xlu1 %311  ;;  %v1152_v51 = vpop.permute.xlu0 %307 }
  0x91   : > { %v337_v41 = vsub.f32 %v1150_v50, %v1225_v22  ;;  %v338_v42 = vsub.f32 %v1150_v50, %v1228_v23  ;;  %v339_v43 = vsub.f32 %v1150_v50, %v1231_v24  ;;  %v334_v45 = vsub.f32 %v1152_v51, %v1240_v28 }
  0x94   : > { %v1154_v52 = vpop.permute.xlu1 %319  ;;  %v1156_v53 = vpop.permute.xlu0 %315 }
  0x98   : > { %v353_v54 = vpop.permute.xlu1 %352  ;;  %v351_v55 = vpop.permute.xlu0 %350 }
  0x99   : > { %v357_v58 = vsel %vm356_vm0, 0.0, %v351_v55  ;;  %v358_v59 = vsel %vm356_vm0, 0.0, %v353_v54  ;;  %v1286_v55 = vld [vmem:[%s1170_s19 + $0x90] sm:$0xff] }
  0x9a   : > { %v360_v62 = vsel %vm359_vm1, %v357_v58, 0.0  ;;  %v361_v63 = vsel %vm359_vm1, %v358_v59, 0.0  ;;  %v1289_v58 = vld [vmem:[%s1170_s19 + $0x98] sm:$0xff]  ;;  %v340_v23 = vsub.f32 %v1156_v53, %v1286_v55 }
  0x9b   : > { %v365_v6 = vrot.slane %v360_v62, 7  ;;  %v366_v12 = vrot.slane %v361_v63, 7  ;;  %v341_v24 = vsub.f32 %v1156_v53, %v1289_v58 }
  0x9c   : > { %v1159_v56 = vpop.permute.xlu1 %461  ;;  %v1161_v57 = vpop.permute.xlu0 %457 }
  0x9d   : > { %v1249_v31 = vsel %vm364_vm2, 0.0, %v365_v6  ;;  %v1268_v40 = vsel %vm364_vm2, %v365_v6, %v366_v12  ;;  %v1277_v44 = vsel %vm364_vm2, %v366_v12, 0.0 }
  0x9e   : > { %v491_v59 = vmul.f32 %v1159_v56, %v1249_v31  ;;  %v492_v4 = vmul.f32 %v1159_v56, %v1268_v40  ;;  %v493_v15 = vmul.f32 %v1159_v56, %v1277_v44  ;;  %v488_v16 = vmul.f32 %v1161_v57, %v1249_v31 }
  0x9f   : > { %v489_v28 = vmul.f32 %v1161_v57, %v1268_v40  ;;  %v342_v56 = vsub.f32 %v1156_v53, %v1300_v3 }
  0xa0   : > { %v1172_v60 = vpop.permute.xlu1 %469  ;;  %v1174_v61 = vpop.permute.xlu0 %465  ;;  %v515_v62 = vadd.f32 %v491_v59, %v325_v34  ;;  %v516_v50 = vadd.f32 %v492_v4, %v326_v35  ;;  %v517_v18 = vadd.f32 %v493_v15, %v327_v36  ;;  %v512_v53 = vadd.f32 %v488_v16, %v322_v19 }
  0xa1   : > { %v497_v55 = vmul.f32 %v1172_v60, %v1249_v31  ;;  %v498_v58 = vmul.f32 %v1172_v60, %v1268_v40  ;;  %v499_v54 = vmul.f32 %v1172_v60, %v1277_v44  ;;  %v494_v34 = vmul.f32 %v1174_v61, %v1249_v31 }
  0xa2   : > { %v513_v59 = vadd.f32 %v489_v28, %v323_v20  ;;  %v495_v35 = vmul.f32 %v1174_v61, %v1268_v40  ;;  %v496_v3 = vmul.f32 %v1174_v61, %v1277_v44 }
  0xa3   : > { %v521_v61 = vadd.f32 %v497_v55, %v331_v25  ;;  %v518_v47 = vadd.f32 %v494_v34, %v328_v13 }
  0xa4   : > { %v1196_v7 = vpop.permute.xlu1 %477  ;;  %v1198_v8 = vpop.permute.xlu0 %473  ;;  %v519_v48 = vadd.f32 %v495_v35, %v329_v14 }
  0xa5   : > { %v504_v60 = vmul.f32 %v1196_v7, %v1268_v40  ;;  %v505_v19 = vmul.f32 %v1196_v7, %v1277_v44  ;;  %v500_v36 = vmul.f32 %v1198_v8, %v1249_v31  ;;  %v501_v5 = vmul.f32 %v1198_v8, %v1268_v40 }
  0xa6   : > { %v502_v9 = vmul.f32 %v1198_v8, %v1277_v44 }
  0xa7   : > { %v1380_v8 = vadd.f32 %v505_v19, %v339_v43  ;;  %v1582_v43 = vsub.f32 %v1152_v51, %v1246_v30 }
  0xa8   : > { %v1251_v32 = vpop.permute.xlu1 %485  ;;  %v1253_v33 = vpop.permute.xlu0 %481 }
  0xa9   : > { %v507_v1 = vmul.f32 %v1253_v33, %v1268_v40  ;;  %v508_v46 = vmul.f32 %v1253_v33, %v1277_v44  ;;  %v1399_v55 = vmul.f32 %v1251_v32, %v1249_v31 }
  0xac   : > { %v544_v6 = vpop.permute.xlu1 %543  ;;  %v542_v12 = vpop.permute.xlu0 %541 }
  0xad   : > { %v548_v17 = vsel %vm356_vm0, 0.0, %v544_v6  ;;  %v547_v22 = vsel %vm356_vm0, 0.0, %v542_v12  ;;  %v490_v6 = vmul.f32 %v1161_v57, %v1277_v44 }
  0xae   : > { %v549_v63 = vsel %vm359_vm1, %v547_v22, 0.0  ;;  %v550_v12 = vsel %vm359_vm1, %v548_v17, 0.0  ;;  %v503_v17 = vmul.f32 %v1196_v7, %v1249_v31  ;;  %v1356_v7 = vadd.f32 %v499_v54, %v333_v27 }
  0xaf   : > { %v553_v57 = vrot.slane %v549_v63, 7  ;;  %v554_v4 = vrot.slane %v550_v12, 7  ;;  %v514_v20 = vadd.f32 %v490_v6, %v324_v21  ;;  %v1351_v63 = vadd.f32 %v498_v58, %v332_v26 }
  0xb0   : > { %v650_v22 = vpop.permute.xlu1 %649  ;;  %v646_v49 = vpop.permute.xlu0 %645  ;;  %v520_v21 = vadd.f32 %v496_v3, %v1580_v11  ;;  %v527_v25 = vadd.f32 %v503_v17, %v337_v41  ;;  %v528_v26 = vadd.f32 %v504_v60, %v338_v42  ;;  %v524_v27 = vadd.f32 %v500_v36, %v334_v45 }
  0xb1   : > { %v1366_v10 = vsel %vm364_vm2, 0.0, %v553_v57  ;;  %v1375_v0 = vsel %vm364_vm2, %v554_v4, 0.0  ;;  %v1378_v13 = vsel %vm364_vm2, %v553_v57, %v554_v4  ;;  %v506_v54 = vmul.f32 %v1253_v33, %v1249_v31 }
  0xb2   : > { %v679_v2 = vmul.f32 %v650_v22, %v1366_v10  ;;  %v1581_v41 = vsub.f32 %v1152_v51, %v1243_v29  ;;  %v526_v45 = vadd.f32 %v502_v9, %v1582_v43  ;;  %v680_v6 = vmul.f32 %v650_v22, %v1378_v13 }
  0xb3   : > { %v681_v12 = vmul.f32 %v650_v22, %v1375_v0  ;;  %v1403_v33 = vmul.f32 %v1251_v32, %v1268_v40  ;;  %v676_v58 = vmul.f32 %v646_v49, %v1366_v10  ;;  %v677_v29 = vmul.f32 %v646_v49, %v1378_v13 }
  0xb4   : > { %v654_v15 = vpop.permute.xlu1 %653  ;;  %v658_v16 = vpop.permute.xlu0 %657  ;;  %v525_v42 = vadd.f32 %v501_v5, %v1581_v41  ;;  %v1409_v51 = vmul.f32 %v1251_v32, %v1277_v44  ;;  %v678_v30 = vmul.f32 %v646_v49, %v1375_v0  ;;  %v1414_v31 = vadd.f32 %v506_v54, %v340_v23 }
  0xb5   : > { %v682_v22 = vmul.f32 %v654_v15, %v1366_v10  ;;  %v683_v34 = vmul.f32 %v654_v15, %v1378_v13  ;;  %v1416_v57 = vadd.f32 %v507_v1, %v341_v24  ;;  %v1418_v40 = vadd.f32 %v508_v46, %v342_v56 }
  0xb6   : > { %v703_v35 = vadd.f32 %v679_v2, %v515_v62  ;;  %v704_v17 = vadd.f32 %v680_v6, %v516_v50  ;;  %v705_v60 = vadd.f32 %v681_v12, %v517_v18  ;;  %v684_v32 = vmul.f32 %v654_v15, %v1375_v0 }
  0xb7   : > { %v685_v44 = vmul.f32 %v658_v16, %v1366_v10  ;;  %v700_v49 = vadd.f32 %v676_v58, %v512_v53  ;;  %v701_v19 = vadd.f32 %v677_v29, %v513_v59  ;;  %v686_v36 = vmul.f32 %v658_v16, %v1378_v13 }
  0xb8   : > { %v662_v14 = vpop.permute.xlu1 %661  ;;  %v666_v28 = vpop.permute.xlu0 %665  ;;  %v687_v23 = vmul.f32 %v658_v16, %v1375_v0  ;;  %v702_v24 = vadd.f32 %v678_v30, %v514_v20  ;;  %v1426_v5 = vadd.f32 %v682_v22, %v518_v47  ;;  %v1428_v56 = vadd.f32 %v683_v34, %v519_v48 }
  0xb9   : > { %v688_v62 = vmul.f32 %v662_v14, %v1366_v10  ;;  %v689_v18 = vmul.f32 %v662_v14, %v1378_v13  ;;  %v690_v50 = vmul.f32 %v662_v14, %v1375_v0  ;;  %v691_v53 = vmul.f32 %v666_v28, %v1366_v10 }
  0xba   : > { %v692_v59 = vmul.f32 %v666_v28, %v1378_v13  ;;  %v708_v16 = vadd.f32 %v684_v32, %v520_v21  ;;  %v1435_v20 = vadd.f32 %v685_v44, %v521_v61  ;;  %v1440_v11 = vadd.f32 %v686_v36, %v1351_v63 }
  0xbb   : > { %v1443_v54 = vadd.f32 %v687_v23, %v1356_v7  ;;  %v712_v2 = vadd.f32 %v688_v62, %v524_v27  ;;  %v693_v14 = vmul.f32 %v666_v28, %v1375_v0  ;;  %v713_v41 = vadd.f32 %v689_v18, %v525_v42 }
  0xbc   : > { %v670_v3 = vpop.permute.xlu1 %669  ;;  %v1420_v4 = vpop.permute.xlu0 %673  ;;  %v714_v43 = vadd.f32 %v690_v50, %v526_v45  ;;  %v1448_v6 = vadd.f32 %v691_v53, %v527_v25  ;;  %v1450_v12 = vadd.f32 %v692_v59, %v528_v26 }
  0xbd   : > { %v694_v7 = vmul.f32 %v670_v3, %v1366_v10  ;;  %v695_v30 = vmul.f32 %v670_v3, %v1378_v13  ;;  %v696_v22 = vmul.f32 %v670_v3, %v1375_v0 }
  0xc0   : > { %v730_v15 = vpop.permute.xlu1 %729  ;;  %v732_v9 = vpop.permute.xlu0 %731 }
  0xc1   : > { %v735_v47 = vsel %vm356_vm0, 0.0, %v730_v15  ;;  %v736_v48 = vsel %vm356_vm0, 0.0, %v732_v9 }
  0xc2   : > { %v737_v1 = vsel %vm359_vm1, %v735_v47, 0.0  ;;  %v738_v46 = vsel %vm359_vm1, %v736_v48, 0.0 }
  0xc3   : > { %v741_v21 = vrot.slane %v737_v1, 7  ;;  %v742_v61 = vrot.slane %v738_v46, 7 }
  0xc4   : > { %v834_v63 = vpop.permute.xlu1 %833  ;;  %v838_v58 = vpop.permute.xlu0 %837 }
  0xc5   : > { %v1454_v29 = vsel %vm364_vm2, 0.0, %v741_v21  ;;  %v1457_v27 = vsel %vm364_vm2, %v741_v21, %v742_v61  ;;  %v1460_v28 = vsel %vm364_vm2, %v742_v61, 0.0 }
  0xc6   : > { %v864_v42 = vmul.f32 %v834_v63, %v1454_v29  ;;  %v865_v25 = vmul.f32 %v834_v63, %v1457_v27  ;;  %v866_v26 = vmul.f32 %v834_v63, %v1460_v28  ;;  %v867_v45 = vmul.f32 %v838_v58, %v1454_v29 }
  0xc7   : > { %v868_v34 = vmul.f32 %v838_v58, %v1457_v27  ;;  %v869_v32 = vmul.f32 %v838_v58, %v1460_v28 }
  0xc8   : > { %v888_v44 = vadd.f32 %v864_v42, %v700_v49  ;;  %v889_v36 = vadd.f32 %v865_v25, %v701_v19  ;;  %v890_v23 = vadd.f32 %v866_v26, %v702_v24  ;;  %v891_v62 = vadd.f32 %v867_v45, %v703_v35  ;;  %v842_v18 = vpop.permute.xlu1 %841  ;;  %v850_v50 = vpop.permute.xlu0 %849 }
  0xc9   : > { %v892_v53 = vadd.f32 %v868_v34, %v704_v17  ;;  %v893_v59 = vadd.f32 %v869_v32, %v705_v60  ;;  %v870_v15 = vmul.f32 %v842_v18, %v1454_v29  ;;  %v871_v9 = vmul.f32 %v842_v18, %v1457_v27 }
  0xca   : > { %913 = vst.msk [vmem:[%s1471_s22] sm:$0xff] %vm912_vm3, %v888_v44  ;;  %914 = vst.msk [vmem:[%s1471_s22 + $0x8] sm:$0xff] %vm912_vm3, %v889_v36  ;;  %v872_v35 = vmul.f32 %v842_v18, %v1460_v28  ;;  %v876_v3 = vmul.f32 %v850_v50, %v1454_v29  ;;  %v877_v17 = vmul.f32 %v850_v50, %v1457_v27 }
  0xcb   : > { %916 = vst.msk [vmem:[%s1471_s22 + $0x10] sm:$0x3] %vm915_vm4, %v890_v23  ;;  %v878_v60 = vmul.f32 %v850_v50, %v1460_v28  ;;  %v717_v49 = vadd.f32 %v693_v14, %v1380_v8  ;;  %v718_v19 = vadd.f32 %v694_v7, %v1414_v31  ;;  %919 = vst.msk [vmem:[%s1471_s22 + $0x28] sm:$0x3] %vm915_vm4, %v893_v59 }
  0xcc   : > { %917 = vst.msk [vmem:[%s1471_s22 + $0x18] sm:$0xff] %vm912_vm3, %v891_v62  ;;  %918 = vst.msk [vmem:[%s1471_s22 + $0x20] sm:$0xff] %vm912_vm3, %v892_v53  ;;  %v894_v24 = vadd.f32 %v870_v15, %v1426_v5  ;;  %v895_v47 = vadd.f32 %v871_v9, %v1428_v56  ;;  %v896_v48 = vadd.f32 %v872_v35, %v708_v16  ;;  %v846_v61 = vpop.permute.xlu1 %845  ;;  %v858_v8 = vpop.permute.xlu0 %857 }
  0xcd   : > { %v900_v1 = vadd.f32 %v876_v3, %v712_v2  ;;  %v901_v46 = vadd.f32 %v877_v17, %v713_v41  ;;  %v902_v21 = vadd.f32 %v878_v60, %v714_v43  ;;  %v873_v31 = vmul.f32 %v846_v61, %v1454_v29 }
  0xce   : > { %920 = vst.msk [vmem:[%s1471_s22 + $0x30] sm:$0xff] %vm912_vm3, %v894_v24  ;;  %921 = vst.msk [vmem:[%s1471_s22 + $0x38] sm:$0xff] %vm912_vm3, %v895_v47  ;;  %v874_v5 = vmul.f32 %v846_v61, %v1457_v27  ;;  %v875_v14 = vmul.f32 %v846_v61, %v1460_v28  ;;  %v882_v56 = vmul.f32 %v858_v8, %v1454_v29 }
  0xcf   : > { %v719_v16 = vadd.f32 %v695_v30, %v1416_v57  ;;  %v720_v2 = vadd.f32 %v696_v22, %v1418_v40  ;;  %922 = vst.msk [vmem:[%s1471_s22 + $0x40] sm:$0x3] %vm915_vm4, %v896_v48  ;;  %928 = vst.msk [vmem:[%s1471_s22 + $0x70] sm:$0x3] %vm915_vm4, %v902_v21  ;;  %v883_v41 = vmul.f32 %v858_v8, %v1457_v27 }
  0xd0   : > { %926 = vst.msk [vmem:[%s1471_s22 + $0x60] sm:$0xff] %vm912_vm3, %v900_v1  ;;  %927 = vst.msk [vmem:[%s1471_s22 + $0x68] sm:$0xff] %vm912_vm3, %v901_v46  ;;  %v884_v43 = vmul.f32 %v858_v8, %v1460_v28  ;;  %v897_v57 = vadd.f32 %v873_v31, %v1435_v20  ;;  %v898_v40 = vadd.f32 %v874_v5, %v1440_v11  ;;  %v854_v45 = vpop.permute.xlu1 %853 }
  0xd1   : > { %v899_v63 = vadd.f32 %v875_v14, %v1443_v54  ;;  %v906_v58 = vadd.f32 %v882_v56, %v718_v19  ;;  %v697_v7 = vmul.f32 %v1420_v4, %v1366_v10  ;;  %v698_v42 = vmul.f32 %v1420_v4, %v1378_v13 }
  0xd2   : > { %v907_v25 = vadd.f32 %v883_v41, %v719_v16  ;;  %v908_v26 = vadd.f32 %v884_v43, %v720_v2  ;;  %v699_v30 = vmul.f32 %v1420_v4, %v1375_v0  ;;  %923 = vst.msk [vmem:[%s1471_s22 + $0x48] sm:$0xff] %vm912_vm3, %v897_v57  ;;  %924 = vst.msk [vmem:[%s1471_s22 + $0x50] sm:$0xff] %vm912_vm3, %v898_v40 }
  0xd3   : > { %925 = vst.msk [vmem:[%s1471_s22 + $0x58] sm:$0x3] %vm915_vm4, %v899_v63  ;;  %v879_v10 = vmul.f32 %v854_v45, %v1454_v29  ;;  %v880_v13 = vmul.f32 %v854_v45, %v1457_v27  ;;  %v881_v20 = vmul.f32 %v854_v45, %v1460_v28  ;;  %v1583_v0 = vsub.f32 %v1154_v52, %v1259_v37 }
  0xd4   : > { %932 = vst.msk [vmem:[%s1471_s22 + $0x90] sm:$0xff] %vm912_vm3, %v906_v58  ;;  %v1584_v11 = vsub.f32 %v1154_v52, %v1262_v38  ;;  %933 = vst.msk [vmem:[%s1471_s22 + $0x98] sm:$0xff] %vm912_vm3, %v907_v25  ;;  %v1585_v22 = vsub.f32 %v1154_v52, %v1265_v39 }
  0xd5   : > { %v533_v4 = vadd.f32 %v1399_v55, %v1583_v0  ;;  %934 = vst.msk [vmem:[%s1471_s22 + $0xa0] sm:$0x3] %vm915_vm4, %v908_v26  ;;  %v903_v32 = vadd.f32 %v879_v10, %v1448_v6  ;;  %v904_v37 = vadd.f32 %v880_v13, %v1450_v12  ;;  %v905_v55 = vadd.f32 %v881_v20, %v717_v49 }
  0xd6   : > { %v534_v54 = vadd.f32 %v1403_v33, %v1584_v11  ;;  %v535_v34 = vadd.f32 %v1409_v51, %v1585_v22  ;;  %v862_v33 = vpop.permute.xlu1 %861 }
  0xd7   : > { %v721_v38 = vadd.f32 %v697_v7, %v533_v4  ;;  %929 = vst.msk [vmem:[%s1471_s22 + $0x78] sm:$0xff] %vm912_vm3, %v903_v32  ;;  %930 = vst.msk [vmem:[%s1471_s22 + $0x80] sm:$0xff] %vm912_vm3, %v904_v37  ;;  %v885_v52 = vmul.f32 %v862_v33, %v1454_v29  ;;  %v886_v39 = vmul.f32 %v862_v33, %v1457_v27 }
  0xd8   : > { %v722_v44 = vadd.f32 %v698_v42, %v534_v54  ;;  %v723_v36 = vadd.f32 %v699_v30, %v535_v34  ;;  %931 = vst.msk [vmem:[%s1471_s22 + $0x88] sm:$0x3] %vm915_vm4, %v905_v55  ;;  %v887_v51 = vmul.f32 %v862_v33, %v1460_v28 }
  0xd9   : > { %v909_v6 = vadd.f32 %v885_v52, %v721_v38 }
  0xda   : > { %v910_v12 = vadd.f32 %v886_v39, %v722_v44  ;;  %v911_v23 = vadd.f32 %v887_v51, %v723_v36 }
  0xdb   : > { %935 = vst.msk [vmem:[%s1471_s22 + $0xa8] sm:$0xff] %vm912_vm3, %v909_v6 }
  0xdc   : > { %936 = vst.msk [vmem:[%s1471_s22 + $0xb0] sm:$0xff] %vm912_vm3, %v910_v12 }
  0xdd   : > { %937 = vst.msk [vmem:[%s1471_s22 + $0xb8] sm:$0x3] %vm915_vm4, %v911_v23 }
  0xde PF: > { %s14_s15 = sadd.s32 1, %s1055_s15  }
  0xdf   : > { %p11_p4 = scmp.ge.s32.totalorder %s14_s15, 4  }
  0xe1   :  { %13 = sbr.rel (!%p11_p4) target bundleno = 1 (0x1), region = 71 }

// kernel: _forward.1
= control target key start
LH: loop header
LB: loop body
LE: loop exit
PB: predicated region body
PF: predicated region fallthrough
CT: control target
= control target key end

     0   :  { %s1021_s15 = smov 0   ;;  %s1464_s0 = inlined_call_operand.vmem [shape: f32[8,3], index: 0, kind: input, shape index: {}]   ;;  %s1465_s1 = inlined_call_operand.vmem [shape: f32[8,1,1], index: 1, kind: input, shape index: {}]   ;;  %s1466_s2 = inlined_call_operand.vmem [shape: f32[2,3,18,18], index: 2, kind: input, shape index: {}]   ;;  %s1467_s3 = inlined_call_operand.vmem [shape: f32[2,8,18,18], index: 3, kind: input, shape index: {}]   ;;  %s1468_s4 = inlined_call_operand.vmem [shape: f32[2,8,18,18], index: 4, kind: output, shape index: {}]  }
   0x1 LB: > { %s939_s16 = sadd.s32 4294967295, %s990_s15   ;;  %p943_p0 = scmp.ge.s32.totalorder %s990_s15, 1  ;;  %s990_s15 = sphi %s1021_s15, %s14_s15  }
   0x2   : > { %p172_p1 = scmp.lt.s32.totalorder %s990_s15, 3 }
   0x4   : > { %p173_p2 = pnand %p943_p0, %p172_p1 }
   0x5   : > { %p203_p3 = scmp.lt.s32.totalorder (!%p173_p2), %s939_s16, 1 }
   0x6   : > { %176 = sbr.rel (%p173_p2) target bundleno = 209 (0xd1), region = 36 }
   0xb   : > { %v949_v0 = vld [vmem:[%s1465_s1 + $0x2] ss:$0 sm:$0xff]  ;;  %v947_v1 = vld [vmem:[%s1465_s1] ss:$0 sm:$0xff]  ;;  %v355_v2 = vlaneseq  ;;  %v992_v3 = vmov 0   ;;  %v994_v38 = vmov 1  }
   0xc   : > { %978 = vset.pattern.permute.xlu1 %v992_v3  ;;  %977 = vset.pattern.permute.xlu0 %v992_v3  ;;  %v950_v4 = vld [vmem:[%s1465_s1 + $0x3] ss:$0 sm:$0xff]  ;;  %v948_v5 = vld [vmem:[%s1465_s1 + $0x1] ss:$0 sm:$0xff]  ;;  %v993_v6 = vmov 1966171168  }
   0xd   : > { %299 = vperm.xlu1 %978, %v949_v0   ;;  %291 = vperm.xlu0 %977, %v947_v1   ;;  %v353_v7 = vunpack.c.l.s4 %v993_v6  ;;  %v356_v8 = vshrl.u32 %v355_v2, 7  ;;  %v349_v9 = vld [vmem:[%s1464_s0] sm:$0xff]  ;;  %v995_v39 = vmov 2   ;;  %s1470_s16 = smov (!%p203_p3, %s939_s16), 1  ;;  %vm846_vm0 = vcmask 146432  }
   0xe   : > { %v351_v11 = vcombine.high %v349_v9, %v349_v9  ;;  %v952_v12 = vld [vmem:[%s1465_s1 + $0x5] ss:$0 sm:$0xff]  ;;  %v951_v13 = vld [vmem:[%s1465_s1 + $0x4] ss:$0 sm:$0xff]  ;;  %v954_v18 = vld [vmem:[%s1465_s1 + $0x7] ss:$0 sm:$0xff] }
   0xf   : > { %v354_v10 = vunpack.c.0.s8 %v353_v7  ;;  %v402_v16 = vsub.s32 0, %v356_v8  ;;  %v953_v19 = vld [vmem:[%s1465_s1 + $0x6] ss:$0 sm:$0xff]  ;;  %s964_s9 = smul.u32 192, %s1470_s16  ;;  %vm849_vm1 = vcmask 140288  }
  0x10   : > { %s963_s13 = smul.u32 72, %s1470_s16 }
  0x11   : > { %303 = vperm.xlu1 %978, %v950_v4   ;;  %295 = vperm.xlu0 %977, %v948_v5   ;;  %v357_v14 = vsub.s32 %v354_v10, %v356_v8  ;;  %s1086_s12 = scalar_lea.vmem %s1467_s3, %s964_s9  ;;  %s1355_s21 = scalar_lea.vmem %s1468_s4, %s964_s9 }
  0x12   : > { %v1090_v50 = vld [vmem:[%s1086_s12 + $0x30] sm:$0xff]  ;;  %v1097_v53 = vld [vmem:[%s1086_s12 + $0x38] sm:$0xff]  ;;  %v1100_v54 = vld [vmem:[%s1086_s12 + $0x40] sm:$0x3]  ;;  %s1124_s18 = scalar_lea.vmem %s1466_s2, %s963_s13 }
  0x13   : > { %v358_v15 = vrot.slane %v349_v9, %v357_v14  ;;  %v365_v17 = vrot.slane %v351_v11, %v357_v14  ;;  %v1103_v55 = vld [vmem:[%s1086_s12] sm:$0xff]  ;;  %v1106_v56 = vld [vmem:[%s1086_s12 + $0x8] sm:$0xff]  ;;  %v1109_v57 = vld [vmem:[%s1086_s12 + $0x10] sm:$0x3] }
  0x14   : > { %v1112_v58 = vld [vmem:[%s1086_s12 + $0x48] sm:$0xff]  ;;  %v1115_v59 = vld [vmem:[%s1086_s12 + $0x50] sm:$0xff]  ;;  %v1118_v60 = vld [vmem:[%s1086_s12 + $0x58] sm:$0x3] }
  0x15   : > { %311 = vperm.xlu1 %978, %v952_v12   ;;  %307 = vperm.xlu0 %977, %v951_v13   ;;  %v366_v20 = vcombine.high %v358_v15, %v358_v15  ;;  %v374_v21 = vrot.slane %v358_v15, %v357_v14  ;;  %v367_v22 = vcombine.high %v365_v17, %v365_v17  ;;  %v229_v61 = vld [vmem:[%s1086_s12 + $0x18] sm:$0xff]  ;;  %v230_v62 = vld [vmem:[%s1086_s12 + $0x20] sm:$0xff]  ;;  %v231_v63 = vld [vmem:[%s1086_s12 + $0x28] sm:$0x3] }
  0x16   : > { %v381_v28 = vrot.slane %v365_v17, %v357_v14  ;;  %v1129_v0 = vld [vmem:[%s1086_s12 + $0x78] sm:$0xff]  ;;  %v1138_v4 = vld [vmem:[%s1086_s12 + $0x80] sm:$0xff]  ;;  %v1141_v5 = vld [vmem:[%s1086_s12 + $0x88] sm:$0x3] }
  0x17   : > { %v388_v23 = vrot.slane %v366_v20, %v357_v14  ;;  %v403_v24 = vrot.slane %v374_v21, %v402_v16  ;;  %v396_v25 = vcombine.high %v374_v21, %v374_v21  ;;  %v395_v31 = vrot.slane %v367_v22, %v357_v14  ;;  %v1144_v6 = vld [vmem:[%s1086_s12 + $0x60] sm:$0xff]  ;;  %v1155_v11 = vld [vmem:[%s1086_s12 + $0x68] sm:$0xff]  ;;  %v1178_v20 = vld [vmem:[%s1124_s18 + $0x10] sm:$0x3] }
  0x18   : > { %v419_v32 = vrot.slane %v381_v28, %v402_v16  ;;  %v397_v35 = vcombine.high %v381_v28, %v381_v28  ;;  %v1158_v12 = vld [vmem:[%s1124_s18] sm:$0xff]  ;;  %v1161_v13 = vld [vmem:[%s1124_s18 + $0x8] sm:$0xff] }
  0x19   : > { %319 = vperm.xlu1 %978, %v954_v18   ;;  %315 = vperm.xlu0 %977, %v953_v19   ;;  %v407_v26 = vrot.slane %v388_v23, %v402_v16  ;;  %v398_v27 = vcombine.high %v388_v23, %v388_v23  ;;  %v411_v30 = vrot.slane %v396_v25, %v402_v16  ;;  %v1172_v18 = vld [vmem:[%s1086_s12 + $0x70] sm:$0x3]  ;;  %v1175_v19 = vld [vmem:[%s1086_s12 + $0xa8] sm:$0xff] }
  0x1a   : > { %v423_v33 = vrot.slane %v395_v31, %v402_v16  ;;  %v399_v34 = vcombine.high %v395_v31, %v395_v31  ;;  %v427_v37 = vrot.slane %v397_v35, %v402_v16  ;;  %v1186_v25 = vld [vmem:[%s1086_s12 + $0xb0] sm:$0xff] }
  0x1b   : > { %v415_v29 = vrot.slane %v398_v27, %v402_v16  ;;  %v1192_v27 = vld [vmem:[%s1086_s12 + $0x90] sm:$0xff] }
  0x1c   : > { %v431_v36 = vrot.slane %v399_v34, %v402_v16 }
  0x1d   : > { %437 = vperm.xlu1 %978, %v407_v26   ;;  %433 = vperm.xlu0 %977, %v403_v24  }
  0x21   : > { %445 = vperm.xlu1 %978, %v415_v29   ;;  %441 = vperm.xlu0 %977, %v411_v30  }
  0x25   : > { %453 = vperm.xlu1 %978, %v423_v33   ;;  %449 = vperm.xlu0 %977, %v419_v32  }
  0x29   : > { %461 = vperm.xlu1 %978, %v431_v36   ;;  %457 = vperm.xlu0 %977, %v427_v37  }
  0x2d   : > { %980 = vset.pattern.permute.xlu1 %v994_v38  ;;  %979 = vset.pattern.permute.xlu0 %v994_v38 }
  0x2e   : > { %604 = vperm.xlu1 %980, %v407_v26   ;;  %600 = vperm.xlu0 %979, %v403_v24  }
  0x32   : > { %608 = vperm.xlu1 %980, %v411_v30   ;;  %612 = vperm.xlu0 %979, %v415_v29  }
  0x36   : > { %616 = vperm.xlu1 %980, %v419_v32   ;;  %620 = vperm.xlu0 %979, %v423_v33  }
  0x3a   : > { %624 = vperm.xlu1 %980, %v427_v37   ;;  %628 = vperm.xlu0 %979, %v431_v36  }
  0x3e   : > { %981 = vset.pattern.permute.xlu1 %v995_v39  ;;  %982 = vset.pattern.permute.xlu0 %v995_v39 }
  0x3f   : > { %767 = vperm.xlu1 %981, %v403_v24   ;;  %771 = vperm.xlu0 %982, %v407_v26   ;;  %v1189_v26 = vld [vmem:[%s1086_s12 + $0xb8] sm:$0x3] }
  0x43   : > { %775 = vperm.xlu1 %981, %v411_v30   ;;  %783 = vperm.xlu0 %982, %v419_v32   ;;  %v1201_v32 = vld [vmem:[%s1086_s12 + $0x98] sm:$0xff] }
  0x47   : > { %779 = vperm.xlu1 %981, %v415_v29   ;;  %791 = vperm.xlu0 %982, %v427_v37  }
  0x4b   : > { %787 = vperm.xlu1 %981, %v423_v33   ;;  %v1204_v33 = vld [vmem:[%s1086_s12 + $0xa0] sm:$0x3] }
  0x4f   : > { %795 = vperm.xlu1 %981, %v431_v36  }
  0x88   : > { %v1056_v40 = vpop.permute.xlu1 %299  ;;  %v1058_v41 = vpop.permute.xlu0 %291 }
  0x89   : > { %v328_v3 = vsub.f32 %v1056_v40, %v1090_v50  ;;  %v329_v7 = vsub.f32 %v1056_v40, %v1097_v53  ;;  %v330_v8 = vsub.f32 %v1056_v40, %v1100_v54  ;;  %v322_v9 = vsub.f32 %v1058_v41, %v1103_v55 }
  0x8a   : > { %v323_v10 = vsub.f32 %v1058_v41, %v1106_v56  ;;  %v324_v14 = vsub.f32 %v1058_v41, %v1109_v57 }
  0x8c   : > { %v1060_v42 = vpop.permute.xlu1 %303  ;;  %v1062_v43 = vpop.permute.xlu0 %295 }
  0x8d   : > { %v331_v15 = vsub.f32 %v1060_v42, %v1112_v58  ;;  %v332_v16 = vsub.f32 %v1060_v42, %v1115_v59  ;;  %v333_v17 = vsub.f32 %v1060_v42, %v1118_v60  ;;  %v325_v21 = vsub.f32 %v1062_v43, %v229_v61 }
  0x8e   : > { %v326_v22 = vsub.f32 %v1062_v43, %v230_v62  ;;  %v327_v23 = vsub.f32 %v1062_v43, %v231_v63 }
  0x90   : > { %v1066_v44 = vpop.permute.xlu1 %311  ;;  %v1068_v45 = vpop.permute.xlu0 %307 }
  0x91   : > { %v337_v24 = vsub.f32 %v1066_v44, %v1129_v0  ;;  %v338_v30 = vsub.f32 %v1066_v44, %v1138_v4  ;;  %v339_v31 = vsub.f32 %v1066_v44, %v1141_v5  ;;  %v334_v36 = vsub.f32 %v1068_v45, %v1144_v6 }
  0x92   : > { %v335_v37 = vsub.f32 %v1068_v45, %v1155_v11  ;;  %v336_v38 = vsub.f32 %v1068_v45, %v1172_v18 }
  0x94   : > { %v1074_v46 = vpop.permute.xlu1 %319  ;;  %v1076_v47 = vpop.permute.xlu0 %315 }
  0x95   : > { %v343_v41 = vsub.f32 %v1074_v46, %v1175_v19  ;;  %v344_v42 = vsub.f32 %v1074_v46, %v1186_v25  ;;  %v345_v43 = vsub.f32 %v1074_v46, %v1189_v26  ;;  %v340_v44 = vsub.f32 %v1076_v47, %v1192_v27 }
  0x96   : > { %v341_v55 = vsub.f32 %v1076_v47, %v1201_v32  ;;  %v342_v45 = vsub.f32 %v1076_v47, %v1204_v33 }
  0x98   : > { %v438_v48 = vpop.permute.xlu1 %437  ;;  %v1079_v49 = vpop.permute.xlu0 %433 }
  0x99   : > { %v467_v34 = vmul.f32 %v438_v48, %v1158_v12  ;;  %v468_v35 = vmul.f32 %v438_v48, %v1161_v13  ;;  %v469_v39 = vmul.f32 %v438_v48, %v1178_v20  ;;  %v464_v48 = vmul.f32 %v1079_v49, %v1158_v12 }
  0x9a   : > { %v465_v56 = vmul.f32 %v1079_v49, %v1161_v13  ;;  %v466_v59 = vmul.f32 %v1079_v49, %v1178_v20 }
  0x9b   : > { %v1231_v57 = vadd.f32 %v467_v34, %v325_v21  ;;  %v1233_v58 = vadd.f32 %v468_v35, %v326_v22  ;;  %v1239_v63 = vadd.f32 %v469_v39, %v327_v23  ;;  %v488_v18 = vadd.f32 %v464_v48, %v322_v9 }
  0x9c   : > { %v1092_v51 = vpop.permute.xlu1 %445  ;;  %v1094_v52 = vpop.permute.xlu0 %441  ;;  %v489_v21 = vadd.f32 %v465_v56, %v323_v10  ;;  %v490_v23 = vadd.f32 %v466_v59, %v324_v14 }
  0x9d   : > { %v473_v60 = vmul.f32 %v1092_v51, %v1158_v12  ;;  %v474_v47 = vmul.f32 %v1092_v51, %v1161_v13  ;;  %v475_v0 = vmul.f32 %v1092_v51, %v1178_v20  ;;  %v470_v4 = vmul.f32 %v1094_v52, %v1158_v12 }
  0x9e   : > { %v471_v5 = vmul.f32 %v1094_v52, %v1161_v13  ;;  %v472_v49 = vmul.f32 %v1094_v52, %v1178_v20 }
  0x9f   : > { %v497_v27 = vadd.f32 %v473_v60, %v331_v15  ;;  %v498_v10 = vadd.f32 %v474_v47, %v332_v16  ;;  %v499_v34 = vadd.f32 %v475_v0, %v333_v17  ;;  %v1278_v16 = vld [vmem:[%s1124_s18 + $0x18] sm:$0xff]  ;;  %v1281_v17 = vld [vmem:[%s1124_s18 + $0x20] sm:$0xff] }
  0xa0   : > { %v1131_v1 = vpop.permute.xlu1 %453  ;;  %v1133_v2 = vpop.permute.xlu0 %449  ;;  %v495_v14 = vadd.f32 %v471_v5, %v329_v7  ;;  %v496_v15 = vadd.f32 %v472_v49, %v330_v8  ;;  %v1288_v7 = vld [vmem:[%s1124_s18 + $0x28] sm:$0x3] }
  0xa1   : > { %v479_v6 = vmul.f32 %v1131_v1, %v1158_v12  ;;  %v480_v11 = vmul.f32 %v1131_v1, %v1161_v13  ;;  %v481_v51 = vmul.f32 %v1131_v1, %v1178_v20  ;;  %v476_v22 = vmul.f32 %v1133_v2, %v1158_v12 }
  0xa2   : > { %v477_v52 = vmul.f32 %v1133_v2, %v1161_v13  ;;  %v478_v32 = vmul.f32 %v1133_v2, %v1178_v20  ;;  %v494_v1 = vadd.f32 %v470_v4, %v328_v3 }
  0xa3   : > { %v1273_v2 = vadd.f32 %v479_v6, %v337_v24  ;;  %v1275_v39 = vadd.f32 %v480_v11, %v338_v30  ;;  %v1283_v50 = vadd.f32 %v481_v51, %v339_v31  ;;  %v500_v3 = vadd.f32 %v476_v22, %v334_v36 }
  0xa4   : > { %v1194_v28 = vpop.permute.xlu1 %461  ;;  %v458_v29 = vpop.permute.xlu0 %457  ;;  %v501_v56 = vadd.f32 %v477_v52, %v335_v37  ;;  %v502_v40 = vadd.f32 %v478_v32, %v336_v38 }
  0xa5   : > { %v482_v35 = vmul.f32 %v458_v29, %v1158_v12  ;;  %v483_v48 = vmul.f32 %v458_v29, %v1161_v13  ;;  %v484_v53 = vmul.f32 %v458_v29, %v1178_v20  ;;  %v1292_v54 = vmul.f32 %v1194_v28, %v1158_v12 }
  0xa6   : > { %v1296_v8 = vmul.f32 %v1194_v28, %v1161_v13  ;;  %v1300_v31 = vmul.f32 %v1194_v28, %v1178_v20 }
  0xa7   : > { %v1302_v36 = vadd.f32 %v482_v35, %v340_v44  ;;  %v1310_v60 = vadd.f32 %v483_v48, %v341_v55  ;;  %v1312_v47 = vadd.f32 %v484_v53, %v342_v45  ;;  %v1330_v48 = vld [vmem:[%s1124_s18 + $0x30] sm:$0xff] }
  0xa9   : > { %v605_v61 = vpop.permute.xlu1 %604  ;;  %v601_v62 = vpop.permute.xlu0 %600 }
  0xaa   : > { %v634_v29 = vmul.f32 %v1278_v16, %v605_v61  ;;  %v635_v37 = vmul.f32 %v1281_v17, %v605_v61  ;;  %v636_v38 = vmul.f32 %v1288_v7, %v605_v61  ;;  %v631_v12 = vmul.f32 %v1278_v16, %v601_v62 }
  0xab   : > { %v632_v59 = vmul.f32 %v1281_v17, %v601_v62  ;;  %v633_v13 = vmul.f32 %v1288_v7, %v601_v62 }
  0xac   : > { %v658_v62 = vadd.f32 %v634_v29, %v1231_v57  ;;  %v659_v5 = vadd.f32 %v635_v37, %v1233_v58  ;;  %v660_v11 = vadd.f32 %v636_v38, %v1239_v63  ;;  %v655_v51 = vadd.f32 %v631_v12, %v488_v18  ;;  %v1333_v57 = vld [vmem:[%s1124_s18 + $0x38] sm:$0xff]  ;;  %v1336_v58 = vld [vmem:[%s1124_s18 + $0x40] sm:$0x3] }
  0xad   : > { %v609_v33 = vpop.permute.xlu1 %608  ;;  %v613_v9 = vpop.permute.xlu0 %612  ;;  %v656_v22 = vadd.f32 %v632_v59, %v489_v21  ;;  %v657_v52 = vadd.f32 %v633_v13, %v490_v23 }
  0xae   : > { %v637_v20 = vmul.f32 %v1278_v16, %v609_v33  ;;  %v638_v28 = vmul.f32 %v1281_v17, %v609_v33  ;;  %v639_v44 = vmul.f32 %v1288_v7, %v609_v33  ;;  %v640_v61 = vmul.f32 %v1278_v16, %v613_v9 }
  0xaf   : > { %v641_v0 = vmul.f32 %v1281_v17, %v613_v9  ;;  %v642_v4 = vmul.f32 %v1288_v7, %v613_v9 }
  0xb0   : > { %v661_v32 = vadd.f32 %v637_v20, %v494_v1  ;;  %v662_v33 = vadd.f32 %v638_v28, %v495_v14  ;;  %v663_v53 = vadd.f32 %v639_v44, %v496_v15  ;;  %v1338_v29 = vadd.f32 %v640_v61, %v497_v27 }
  0xb1   : > { %v617_v24 = vpop.permute.xlu1 %616  ;;  %v621_v30 = vpop.permute.xlu0 %620  ;;  %v1340_v63 = vadd.f32 %v641_v0, %v498_v10  ;;  %v1342_v18 = vadd.f32 %v642_v4, %v499_v34 }
  0xb2   : > { %v643_v49 = vmul.f32 %v1278_v16, %v617_v24  ;;  %v644_v6 = vmul.f32 %v1281_v17, %v617_v24  ;;  %v645_v9 = vmul.f32 %v1288_v7, %v617_v24  ;;  %v646_v35 = vmul.f32 %v1278_v16, %v621_v30 }
  0xb3   : > { %v647_v1 = vmul.f32 %v1281_v17, %v621_v30  ;;  %v648_v14 = vmul.f32 %v1288_v7, %v621_v30 }
  0xb4   : > { %v667_v21 = vadd.f32 %v643_v49, %v500_v3  ;;  %v668_v23 = vadd.f32 %v644_v6, %v501_v56  ;;  %v669_v10 = vadd.f32 %v645_v9, %v502_v40  ;;  %v1358_v34 = vadd.f32 %v646_v35, %v1273_v2 }
  0xb5   : > { %v625_v55 = vpop.permute.xlu1 %624  ;;  %v1320_v45 = vpop.permute.xlu0 %628  ;;  %v1363_v28 = vadd.f32 %v647_v1, %v1275_v39  ;;  %v672_v1 = vadd.f32 %v648_v14, %v1283_v50 }
  0xb6   : > { %v649_v44 = vmul.f32 %v1278_v16, %v625_v55  ;;  %v651_v6 = vmul.f32 %v1288_v7, %v625_v55 }
  0xba   : > { %v768_v24 = vpop.permute.xlu1 %767  ;;  %v772_v37 = vpop.permute.xlu0 %771 }
  0xbb   : > { %v798_v38 = vmul.f32 %v1330_v48, %v768_v24  ;;  %v799_v12 = vmul.f32 %v1333_v57, %v768_v24  ;;  %v800_v15 = vmul.f32 %v1336_v58, %v768_v24  ;;  %v801_v27 = vmul.f32 %v1330_v48, %v772_v37 }
  0xbc   : > { %v802_v3 = vmul.f32 %v1333_v57, %v772_v37  ;;  %v803_v56 = vmul.f32 %v1336_v58, %v772_v37 }
  0xbd   : > { %v822_v30 = vadd.f32 %v798_v38, %v655_v51  ;;  %v823_v59 = vadd.f32 %v799_v12, %v656_v22  ;;  %v824_v13 = vadd.f32 %v800_v15, %v657_v52  ;;  %v825_v20 = vadd.f32 %v801_v27, %v658_v62 }
  0xbe   : > { %v826_v40 = vadd.f32 %v802_v3, %v659_v5  ;;  %v827_v61 = vadd.f32 %v803_v56, %v660_v11  ;;  %v776_v2 = vpop.permute.xlu1 %775  ;;  %v784_v0 = vpop.permute.xlu0 %783  ;;  %v650_v5 = vmul.f32 %v1281_v17, %v625_v55  ;;  %v673_v55 = vadd.f32 %v649_v44, %v1302_v36 }
  0xbf   : > { %847 = vst.msk [vmem:[%s1355_s21] sm:$0xff] %vm846_vm0, %v822_v30  ;;  %848 = vst.msk [vmem:[%s1355_s21 + $0x8] sm:$0xff] %vm846_vm0, %v823_v59  ;;  %v804_v4 = vmul.f32 %v1330_v48, %v776_v2  ;;  %v805_v39 = vmul.f32 %v1333_v57, %v776_v2  ;;  %v806_v62 = vmul.f32 %v1336_v58, %v776_v2 }
  0xc0   : > { %850 = vst.msk [vmem:[%s1355_s21 + $0x10] sm:$0x3] %vm849_vm1, %v824_v13  ;;  %v810_v49 = vmul.f32 %v1330_v48, %v784_v0  ;;  %853 = vst.msk [vmem:[%s1355_s21 + $0x28] sm:$0x3] %vm849_vm1, %v827_v61  ;;  %v811_v11 = vmul.f32 %v1333_v57, %v784_v0  ;;  %v812_v51 = vmul.f32 %v1336_v58, %v784_v0 }
  0xc1   : > { %851 = vst.msk [vmem:[%s1355_s21 + $0x18] sm:$0xff] %vm846_vm0, %v825_v20  ;;  %852 = vst.msk [vmem:[%s1355_s21 + $0x20] sm:$0xff] %vm846_vm0, %v826_v40  ;;  %v828_v22 = vadd.f32 %v804_v4, %v661_v32  ;;  %v829_v52 = vadd.f32 %v805_v39, %v662_v33  ;;  %v830_v9 = vadd.f32 %v806_v62, %v663_v53 }
  0xc2   : > { %v834_v35 = vadd.f32 %v810_v49, %v667_v21  ;;  %v835_v24 = vadd.f32 %v811_v11, %v668_v23  ;;  %v836_v37 = vadd.f32 %v812_v51, %v669_v10  ;;  %v780_v38 = vpop.permute.xlu1 %779  ;;  %v792_v12 = vpop.permute.xlu0 %791  ;;  %v674_v53 = vadd.f32 %v650_v5, %v1310_v60 }
  0xc3   : > { %854 = vst.msk [vmem:[%s1355_s21 + $0x30] sm:$0xff] %vm846_vm0, %v828_v22  ;;  %855 = vst.msk [vmem:[%s1355_s21 + $0x38] sm:$0xff] %vm846_vm0, %v829_v52  ;;  %v807_v32 = vmul.f32 %v1330_v48, %v780_v38  ;;  %v808_v50 = vmul.f32 %v1333_v57, %v780_v38  ;;  %v809_v33 = vmul.f32 %v1336_v58, %v780_v38 }
  0xc4   : > { %856 = vst.msk [vmem:[%s1355_s21 + $0x40] sm:$0x3] %vm849_vm1, %v830_v9  ;;  %v816_v36 = vmul.f32 %v1330_v48, %v792_v12  ;;  %v675_v21 = vadd.f32 %v651_v6, %v1312_v47  ;;  %862 = vst.msk [vmem:[%s1355_s21 + $0x70] sm:$0x3] %vm849_vm1, %v836_v37  ;;  %v817_v23 = vmul.f32 %v1333_v57, %v792_v12 }
  0xc5   : > { %860 = vst.msk [vmem:[%s1355_s21 + $0x60] sm:$0xff] %vm846_vm0, %v834_v35  ;;  %861 = vst.msk [vmem:[%s1355_s21 + $0x68] sm:$0xff] %vm846_vm0, %v835_v24  ;;  %v818_v14 = vmul.f32 %v1336_v58, %v792_v12  ;;  %v831_v15 = vadd.f32 %v807_v32, %v1338_v29  ;;  %v832_v27 = vadd.f32 %v808_v50, %v1340_v63 }
  0xc6   : > { %v833_v60 = vadd.f32 %v809_v33, %v1342_v18  ;;  %v840_v10 = vadd.f32 %v816_v36, %v673_v55  ;;  %v652_v47 = vmul.f32 %v1278_v16, %v1320_v45  ;;  %v653_v3 = vmul.f32 %v1281_v17, %v1320_v45  ;;  %v788_v59 = vpop.permute.xlu1 %787 }
  0xc7   : > { %v841_v56 = vadd.f32 %v817_v23, %v674_v53  ;;  %v842_v30 = vadd.f32 %v818_v14, %v675_v21  ;;  %v654_v13 = vmul.f32 %v1288_v7, %v1320_v45  ;;  %857 = vst.msk [vmem:[%s1355_s21 + $0x48] sm:$0xff] %vm846_vm0, %v831_v15  ;;  %858 = vst.msk [vmem:[%s1355_s21 + $0x50] sm:$0xff] %vm846_vm0, %v832_v27 }
  0xc8   : > { %859 = vst.msk [vmem:[%s1355_s21 + $0x58] sm:$0x3] %vm849_vm1, %v833_v60  ;;  %v813_v16 = vmul.f32 %v1330_v48, %v788_v59  ;;  %v814_v17 = vmul.f32 %v1333_v57, %v788_v59  ;;  %v815_v29 = vmul.f32 %v1336_v58, %v788_v59  ;;  %v509_v7 = vadd.f32 %v1292_v54, %v343_v41 }
  0xc9   : > { %866 = vst.msk [vmem:[%s1355_s21 + $0x90] sm:$0xff] %vm846_vm0, %v840_v10  ;;  %v510_v45 = vadd.f32 %v1296_v8, %v344_v42  ;;  %867 = vst.msk [vmem:[%s1355_s21 + $0x98] sm:$0xff] %vm846_vm0, %v841_v56  ;;  %v511_v63 = vadd.f32 %v1300_v31, %v345_v43 }
  0xca   : > { %868 = vst.msk [vmem:[%s1355_s21 + $0xa0] sm:$0x3] %vm849_vm1, %v842_v30  ;;  %v837_v18 = vadd.f32 %v813_v16, %v1358_v34  ;;  %v838_v19 = vadd.f32 %v814_v17, %v1363_v28  ;;  %v839_v41 = vadd.f32 %v815_v29, %v672_v1  ;;  %v676_v25 = vadd.f32 %v652_v47, %v509_v7  ;;  %v796_v42 = vpop.permute.xlu1 %795 }
  0xcb   : > { %v677_v54 = vadd.f32 %v653_v3, %v510_v45  ;;  %v678_v8 = vadd.f32 %v654_v13, %v511_v63  ;;  %v819_v46 = vmul.f32 %v1330_v48, %v796_v42  ;;  %v820_v26 = vmul.f32 %v1333_v57, %v796_v42 }
  0xcc   : > { %863 = vst.msk [vmem:[%s1355_s21 + $0x78] sm:$0xff] %vm846_vm0, %v837_v18  ;;  %864 = vst.msk [vmem:[%s1355_s21 + $0x80] sm:$0xff] %vm846_vm0, %v838_v19  ;;  %v821_v43 = vmul.f32 %v1336_v58, %v796_v42 }
  0xcd   : > { %865 = vst.msk [vmem:[%s1355_s21 + $0x88] sm:$0x3] %vm849_vm1, %v839_v41  ;;  %v843_v31 = vadd.f32 %v819_v46, %v676_v25  ;;  %v844_v34 = vadd.f32 %v820_v26, %v677_v54 }
  0xce   : > { %v845_v20 = vadd.f32 %v821_v43, %v678_v8 }
  0xcf   : > { %869 = vst.msk [vmem:[%s1355_s21 + $0xa8] sm:$0xff] %vm846_vm0, %v843_v31  ;;  %870 = vst.msk [vmem:[%s1355_s21 + $0xb0] sm:$0xff] %vm846_vm0, %v844_v34 }
  0xd0   : > { %871 = vst.msk [vmem:[%s1355_s21 + $0xb8] sm:$0x3] %vm849_vm1, %v845_v20 }
  0xd1 PF: > { %s14_s15 = sadd.s32 1, %s990_s15  }
  0xd2   : > { %p11_p4 = scmp.ge.s32.totalorder %s14_s15, 4  }
  0xd4   :  { %13 = sbr.rel (!%p11_p4) target bundleno = 1 (0x1), region = 71 }

</bundles_post_ra>
